<compile_context>
chip_gen: v5e
topology: v5e:2x2
jax: 0.10.0
libtpu: 0.0.40
codegen_flags: <defaults>
</compile_context>

<pallas_src>
import jax
import jax.numpy as jnp
from jax.experimental import pallas as pl
from jax.experimental.pallas import tpu as pltpu


def _make_kernel(use_mxu: bool):
    def kernel(x_ref, w_ref, shift_ref, o_ref):
        # x_ref:     (C_in, TS)    f32 activation tile (spatial on the lane axis)
        # w_ref:     (C_out, C_in) scale-folded 1x1-conv weight (grid-invariant)
        # shift_ref: (C_out, 1)    folded BN shift (conv bias + running mean folded in)
        # o_ref:     (C_out, TS)   lane-dense output tile
        x = x_ref[...]
        if use_mxu:
            # Cast to bf16 in-kernel (free on the VPU, hides under the DMA),
            # f32 accumulation on the MXU.
            acc = jnp.dot(w_ref[...], x.astype(jnp.bfloat16),
                          preferred_element_type=jnp.float32)
        else:
            # Tiny-K path: unrolled broadcast-FMA chain on the VPU
            # (MXU would be >95% idle at K=4).
            xf = x.astype(jnp.float32)
            wf = w_ref[...].astype(jnp.float32)
            acc = wf[:, 0:1] * xf[0:1, :]
            for ci in range(1, xf.shape[0]):
                acc = acc + wf[:, ci:ci + 1] * xf[ci:ci + 1, :]
        bn = acc + shift_ref[...]                               # eval-mode BN (f32)
        o_ref[...] = jnp.maximum(bn, 0.0).astype(o_ref.dtype)   # ReLU
    return kernel


def _chip_vmem_policy():
    """(tile budget bytes, vmem_limit cap bytes) branched on per-core VMEM."""
    vmem = 64 << 20  # conservative default (v7x has 64 MiB per TC)
    try:
        info = pltpu.get_tpu_info()
        vmem = int(getattr(info, "vmem_capacity_bytes", vmem))
    except Exception:
        pass
    if vmem <= (80 << 20):            # v7x-class part
        return 20 << 20, 40 << 20
    return 32 << 20, 48 << 20         # v5e / v6e (128 MiB)


def _pick_spatial_tile(hw, c_in, c_out, out_bytes, budget_bytes, lane_cap=2048):
    """Largest legal spatial tile whose VMEM footprint fits the budget,
    capped so each image spans >=2 grid steps (pipeline overlap + v7x 2-TC)."""
    # double-buffered f32 input + double-buffered output
    # + non-double-buffered f32 accumulator + bf16 in-kernel copy of x
    per_col = 2 * (c_in * 4 + c_out * out_bytes) + c_out * 4 + c_in * 2
    max_cols = max(128, budget_bytes // max(per_col, 1))
    tile = min(hw, max_cols, lane_cap)
    if tile < hw:
        tile = max(128, (tile // 128) * 128)       # lane-aligned partial tiling
    if hw > 128:
        # force >= 2 spatial slices per image (128-multiple)
        half = (((hw + 1) // 2) + 127) // 128 * 128
        tile = min(tile, max(128, half))
    return tile


def reassemble_block(x_nchw, conv_w, conv_b, gamma, beta, running_mean,
                     running_var, eps=1e-5, out_dtype=jnp.float32):
    """Fused 1x1 conv + BatchNorm2d(eval) + ReLU, computed in NCHW.

    x_nchw : (N, C_in, H, W) float32
    conv_w : (C_out, C_in, 1, 1)   conv_b: (C_out,)
    gamma, beta, running_mean, running_var : (C_out,)
    returns (N, C_out, H, W) in out_dtype (f32 default, bf16 optional)
    """
    N, C_in, H, W = x_nchw.shape
    C_out = conv_w.shape[0]
    HW = H * W

    use_mxu = C_in > 16
    w_dtype = jnp.bfloat16 if use_mxu else jnp.float32

    # Free reshape only — no NCHW<->NHWC transpose, no pad/slice, NO wrapper cast
    # of the activations (the f32->bf16 cast happens inside the kernel).
    x = x_nchw.reshape(N, C_in, HW)

    # Fold eval-mode BN into the weight (scale) and a per-channel shift, all in
    # f32 BEFORE any bf16 cast (avoids double rounding).  conv bias folded too.
    inv_std = jax.lax.rsqrt(running_var.astype(jnp.float32) + eps)
    g32 = gamma.astype(jnp.float32)
    scale = (g32 * inv_std).reshape(C_out, 1)                       # (C_out, 1)
    w_mat = (scale * conv_w.reshape(C_out, C_in).astype(jnp.float32)
             ).astype(w_dtype)                                      # (C_out, C_in)
    shift = (beta.astype(jnp.float32)
             + (conv_b.astype(jnp.float32) - running_mean.astype(jnp.float32))
             * g32 * inv_std).reshape(C_out, 1)                     # (C_out, 1)

    out_bytes = jnp.dtype(out_dtype).itemsize
    w_bytes = jnp.dtype(w_dtype).itemsize

    budget_bytes, limit_cap = _chip_vmem_policy()
    tile_s = _pick_spatial_tile(HW, C_in, C_out, out_bytes, budget_bytes)
    grid = (N, pl.cdiv(HW, tile_s))      # partial last block masked by Pallas

    const_bytes = C_out * C_in * w_bytes + C_out * 4
    work_bytes = (2 * tile_s * (C_in * 4 + C_out * out_bytes)
                  + tile_s * (C_out * 4 + C_in * 2)
                  + 2 * const_bytes)
    vmem_limit = int(min(max(work_bytes + (8 << 20), 32 << 20), limit_cap))

    cost = pl.CostEstimate(
        flops=int(2 * N * HW * C_in * C_out),
        transcendentals=0,
        bytes_accessed=int(N * HW * C_in * 4            # f32 activations in
                           + C_out * C_in * w_bytes     # weight
                           + C_out * 4                  # shift
                           + N * HW * C_out * out_bytes),
    )

    out = pl.pallas_call(
        _make_kernel(use_mxu),
        out_shape=jax.ShapeDtypeStruct((N, C_out, HW), out_dtype),
        grid_spec=pltpu.PrefetchScalarGridSpec(
            num_scalar_prefetch=0,
            grid=grid,
            in_specs=[
                pl.BlockSpec((None, C_in, tile_s), lambda n, s: (n, 0, s)),
                pl.BlockSpec((C_out, C_in), lambda n, s: (0, 0)),
                pl.BlockSpec((C_out, 1), lambda n, s: (0, 0)),
            ],
            out_specs=pl.BlockSpec((None, C_out, tile_s), lambda n, s: (n, 0, s)),
        ),
        compiler_params=pltpu.CompilerParams(
            dimension_semantics=("parallel", "parallel"),
            vmem_limit_bytes=vmem_limit),
        cost_estimate=cost,
    )(x, w_mat, shift)

    return out.reshape(N, C_out, H, W)


def _reference(x_nchw, conv_w, conv_b, gamma, beta, running_mean,
               running_var, eps=1e-5):
    # pure-JAX reference (eval-mode BN), kept in NCHW
    C_out, C_in = conv_w.shape[0], conv_w.shape[1]
    w = conv_w.reshape(C_out, C_in)
    conv = jnp.einsum('oc,nchw->nohw', w, x_nchw) + conv_b[None, :, None, None]
    inv_std = jax.lax.rsqrt(running_var + eps)
    bn = ((conv - running_mean[None, :, None, None])
          * (gamma * inv_std)[None, :, None, None]
          + beta[None, :, None, None])
    return jnp.maximum(bn, 0.0)


if __name__ == "__main__":
    key = jax.random.PRNGKey(0)

    def make_params(k, c_in, c_out):
        k_w, k_b, k_g, k_be, k_m, k_v = jax.random.split(k, 6)
        conv_w = jax.random.normal(k_w, (c_out, c_in, 1, 1), jnp.float32) * 0.1
        conv_b = jax.random.normal(k_b, (c_out,), jnp.float32) * 0.1
        gamma = 1.0 + 0.1 * jax.random.normal(k_g, (c_out,), jnp.float32)
        beta = 0.1 * jax.random.normal(k_be, (c_out,), jnp.float32)
        mean = 0.1 * jax.random.normal(k_m, (c_out,), jnp.float32)
        var = jnp.abs(1.0 + 0.1 * jax.random.normal(k_v, (c_out,), jnp.float32))
        return conv_w, conv_b, gamma, beta, mean, var

    k1, k2, k3, k4, k5 = jax.random.split(key, 5)

    # ---- test 1: tiny channels (VPU contraction path), f32 output ----
    N, C_in, H, W, C_out = 2, 4, 16, 16, 8
    x = jax.random.normal(k1, (N, C_in, H, W), jnp.float32)
    params = make_params(k2, C_in, C_out)
    out = jax.block_until_ready(reassemble_block(x, *params))
    ref = _reference(x, *params)
    assert out.shape == (N, C_out, H, W)
    assert jnp.allclose(out, ref, atol=1e-5, rtol=1e-5), "tiny-channel path mismatch"

    # ---- test 2: non-divisible spatial extent -> masked partial last block ----
    xb = jax.random.normal(k3, (N, C_in, 13, 13), jnp.float32)   # HW=169 -> tiles of 128
    out_b = jax.block_until_ready(reassemble_block(xb, *params))
    ref_b = _reference(xb, *params)
    assert jnp.allclose(out_b, ref_b, atol=1e-5, rtol=1e-5), "masked-tail mismatch"

    # ---- test 3: MXU path, in-kernel bf16 cast (DINOv2-like channel counts) ----
    C_in2, C_out2 = 256, 128
    x2 = jax.random.normal(k4, (N, C_in2, H, W), jnp.float32)
    params2 = make_params(k5, C_in2, C_out2)
    out2 = jax.block_until_ready(reassemble_block(x2, *params2))
    ref2 = _reference(x2, *params2)
    assert jnp.allclose(out2, ref2, atol=5e-2, rtol=5e-2), "MXU/bf16 path mismatch"

    # ---- test 4: optional bf16 output mode (halved write traffic) ----
    out3 = jax.block_until_ready(
        reassemble_block(x2, *params2, out_dtype=jnp.bfloat16))
    assert out3.dtype == jnp.bfloat16
    assert jnp.allclose(out3.astype(jnp.float32), ref2, atol=1e-1, rtol=1e-1), \
        "bf16-output path mismatch"

    print("KERNEL_OK")
</pallas_src>

<mosaic_0001>
module attributes {stable_mosaic.version = 11 : i64} {
  func.func @kernel(%arg0: i32, %arg1: i32, %arg2: memref<1x4x128xf32, #tpu.memory_space<vmem>>, %arg3: memref<8x4xf32, #tpu.memory_space<vmem>>, %arg4: memref<8x1xf32, #tpu.memory_space<vmem>>, %arg5: memref<1x8x128xf32, #tpu.memory_space<vmem>>) attributes {dimension_semantics = [#tpu.dimension_semantics<parallel>, #tpu.dimension_semantics<parallel>], iteration_bounds = array<i64: 2, 2>, scalar_prefetch = 0 : i64, scratch_operands = 0 : i64, tpu.core_type = #tpu.core_type<tc>, window_params = [{transform_indices = @transform_0, window_bounds = array<i64: 1, 4, 128>}, {pipeline_mode = #tpu.pipeline_mode<synchronous>, transform_indices = @transform_1, window_bounds = array<i64: 8, 4>}, {pipeline_mode = #tpu.pipeline_mode<synchronous>, transform_indices = @transform_2, window_bounds = array<i64: 8, 1>}, {transform_indices = @transform_3, window_bounds = array<i64: 1, 8, 128>}]} {
    %c0 = arith.constant 0 : index
    %c0_0 = arith.constant 0 : index
    %c0_1 = arith.constant 0 : index
    %0 = vector.load %arg2[%c0, %c0_0, %c0_1] : memref<1x4x128xf32, #tpu.memory_space<vmem>>, vector<1x4x128xf32>
    %1 = vector.shape_cast %0 : vector<1x4x128xf32> to vector<4x128xf32>
    %c0_2 = arith.constant 0 : index
    %c0_3 = arith.constant 0 : index
    %2 = vector.load %arg3[%c0_2, %c0_3] : memref<8x4xf32, #tpu.memory_space<vmem>>, vector<8x4xf32>
    %3 = vector.extract_strided_slice %2 {offsets = [0, 0], sizes = [8, 1], strides = [1, 1]} : vector<8x4xf32> to vector<8x1xf32>
    %4 = vector.extract_strided_slice %1 {offsets = [0, 0], sizes = [1, 128], strides = [1, 1]} : vector<4x128xf32> to vector<1x128xf32>
    %5 = vector.broadcast %3 : vector<8x1xf32> to vector<8x128xf32>
    %6 = vector.broadcast %4 : vector<1x128xf32> to vector<8x128xf32>
    %7 = arith.mulf %5, %6 : vector<8x128xf32>
    %8 = vector.extract_strided_slice %2 {offsets = [0, 1], sizes = [8, 1], strides = [1, 1]} : vector<8x4xf32> to vector<8x1xf32>
    %9 = vector.extract_strided_slice %1 {offsets = [1, 0], sizes = [1, 128], strides = [1, 1]} : vector<4x128xf32> to vector<1x128xf32>
    %10 = vector.broadcast %8 : vector<8x1xf32> to vector<8x128xf32>
    %11 = vector.broadcast %9 : vector<1x128xf32> to vector<8x128xf32>
    %12 = arith.mulf %10, %11 : vector<8x128xf32>
    %13 = arith.addf %7, %12 : vector<8x128xf32>
    %14 = vector.extract_strided_slice %2 {offsets = [0, 2], sizes = [8, 1], strides = [1, 1]} : vector<8x4xf32> to vector<8x1xf32>
    %15 = vector.extract_strided_slice %1 {offsets = [2, 0], sizes = [1, 128], strides = [1, 1]} : vector<4x128xf32> to vector<1x128xf32>
    %16 = vector.broadcast %14 : vector<8x1xf32> to vector<8x128xf32>
    %17 = vector.broadcast %15 : vector<1x128xf32> to vector<8x128xf32>
    %18 = arith.mulf %16, %17 : vector<8x128xf32>
    %19 = arith.addf %13, %18 : vector<8x128xf32>
    %20 = vector.extract_strided_slice %2 {offsets = [0, 3], sizes = [8, 1], strides = [1, 1]} : vector<8x4xf32> to vector<8x1xf32>
    %21 = vector.extract_strided_slice %1 {offsets = [3, 0], sizes = [1, 128], strides = [1, 1]} : vector<4x128xf32> to vector<1x128xf32>
    %22 = vector.broadcast %20 : vector<8x1xf32> to vector<8x128xf32>
    %23 = vector.broadcast %21 : vector<1x128xf32> to vector<8x128xf32>
    %24 = arith.mulf %22, %23 : vector<8x128xf32>
    %25 = arith.addf %19, %24 : vector<8x128xf32>
    %c0_4 = arith.constant 0 : index
    %c0_5 = arith.constant 0 : index
    %26 = vector.load %arg4[%c0_4, %c0_5] : memref<8x1xf32, #tpu.memory_space<vmem>>, vector<8x1xf32>
    %27 = vector.broadcast %26 : vector<8x1xf32> to vector<8x128xf32>
    %28 = arith.addf %25, %27 : vector<8x128xf32>
    %cst = arith.constant 0.000000e+00 : f32
    %29 = vector.broadcast %cst : f32 to vector<8x128xf32>
    %30 = arith.maximumf %28, %29 : vector<8x128xf32>
    %c0_6 = arith.constant 0 : index
    %c0_7 = arith.constant 0 : index
    %c0_8 = arith.constant 0 : index
    %31 = vector.load %arg5[%c0_6, %c0_7, %c0_8] : memref<1x8x128xf32, #tpu.memory_space<vmem>>, vector<1x8x128xf32>
    %32 = vector.shape_cast %31 : vector<1x8x128xf32> to vector<8x128xf32>
    %33 = vector.shape_cast %30 : vector<8x128xf32> to vector<1x8x128xf32>
    tpu.vector_store %arg5[%c0_6, %c0_7, %c0_8], %33 {strides = array<i32>} : memref<1x8x128xf32, #tpu.memory_space<vmem>>, vector<1x8x128xf32>,
    return
  }
  func.func @transform_0(%arg0: i32, %arg1: i32) -> (i32, i32, i32) {
    %c0_i32 = arith.constant 0 : i32
    %c0_i32_0 = arith.constant 0 : i32
    return %arg0, %c0_i32, %arg1 : i32, i32, i32
  }
  func.func @transform_1(%arg0: i32, %arg1: i32) -> (i32, i32) {
    %c0_i32 = arith.constant 0 : i32
    %c0_i32_0 = arith.constant 0 : i32
    %c0_i32_1 = arith.constant 0 : i32
    return %c0_i32, %c0_i32_0 : i32, i32
  }
  func.func @transform_2(%arg0: i32, %arg1: i32) -> (i32, i32) {
    %c0_i32 = arith.constant 0 : i32
    %c0_i32_0 = arith.constant 0 : i32
    %c0_i32_1 = arith.constant 0 : i32
    return %c0_i32, %c0_i32_0 : i32, i32
  }
  func.func @transform_3(%arg0: i32, %arg1: i32) -> (i32, i32, i32) {
    %c0_i32 = arith.constant 0 : i32
    %c0_i32_0 = arith.constant 0 : i32
    return %arg0, %c0_i32, %arg1 : i32, i32, i32
  }
}

</mosaic_0001>

<bundles_post_ra>
// kernel: tpu_custom_call.1
= control target key start
LH: loop header
LB: loop body
LE: loop exit
PB: predicated region body
PF: predicated region fallthrough
CT: control target
= control target key end

     0   :  { %8 = vsyncpa [#allocation3], 0  ;;  %s671_s0 = inlined_call_operand.vmem [shape: f32[2,4,256], index: 0, kind: input, shape index: {}]   ;;  %s672_s1 = inlined_call_operand.vmem [shape: f32[8,4], index: 1, kind: input, shape index: {}]   ;;  %s673_s2 = inlined_call_operand.vmem [shape: f32[8,1], index: 2, kind: input, shape index: {}]   ;;  %s674_s3 = inlined_call_operand.hbm [shape: f32[2,8,256], index: 3, kind: output, shape index: {}]  }
   0x1   :  { %10 = vsyncpa [#allocation3 + $0x1], 0  ;;  %s543_s12 = smov 0   ;;  %s545_s13 = smov 0  }
   0x2   :  { %s547_s14 = smov 0   ;;  %s549_s15 = smov 0  }
   0x3   :  { %s551_s16 = smov 0   ;;  %s553_s17 = smov 0  }
   0x4   :  { %s555_s18 = smov 0   ;;  %s557_s19 = smov 0  }
   0x5 LB: > { %s329_s20 = sadd.s32 4294967295, %s517_s19   ;;  %s330_s21 = sadd.s32 4294967294, %s517_s19   ;;  %s517_s19 = sphi %s557_s19, %s16_s19   ;;  %s513_s18 = sphi %s555_s18, %s683_s18   ;;  %s509_s17 = sphi %s553_s17, %s682_s17   ;;  %s505_s16 = sphi %s551_s16, %s681_s16   ;;  %s501_s15 = sphi %s549_s15, %s680_s15   ;;  %s497_s14 = sphi %s547_s14, %s679_s14   ;;  %s493_s13 = sphi %s545_s13, %s678_s13   ;;  %s489_s12 = sphi %s543_s12, %s677_s12  }
   0x6   : > { %s25_s22 = sadd.s32 1, %s509_s17  ;;  %s28_s23 = sadd.s32 1, %s513_s18 }
   0x7   : > { %p26_p0 = scmp.ge.s32.totalorder %s25_s22, 2  ;;  %p117_p1 = scmp.ne.s32.totalorder %s497_s14, %s493_s13 }
   0x8   : > { %p118_p2 = scmp.eq.s32.totalorder %s329_s20, 3  ;;  %p123_p5 = scmp.ne.s32.totalorder %s493_s13, %s489_s12 }
   0x9   : > { %s685_s22 = smov (%p26_p0, %s25_s22), 0  ;;  %s687_s23 = smov (!%p26_p0, %s28_s23), %s513_s18 }
   0xa   : > { %s103_s24 = ssub.s32 %s509_s17, %s685_s22  ;;  %p594_p3 = por %p118_p2, %p117_p1 }
   0xb   : > { %p30_p4 = scmp.ge.s32.totalorder %s687_s23, 2  ;;  %p124_p6 = scmp.eq.s32.totalorder %s330_s21, 3 }
   0xc   : > { %p333_p7 = scmp.ge.s32.totalorder %s517_s19, 1  ;;  %p159_p9 = scmp.lt.s32.totalorder %s517_s19, 5 }
   0xd   : > { %s689_s23 = smov (%p30_p4, %s687_s23), 0  ;;  %p603_p8 = por %p124_p6, %p123_p5 }
   0xe   : > { %s102_s27 = ssub.s32 %s513_s18, %s689_s23  ;;  %s107_s28 = sadd.s32 1, %s497_s14 }
   0xf   : > { %s104_s29 = sor.u32 %s103_s24, %s102_s27  ;;  %p160_p10 = pnand %p333_p7, %p159_p9 }
  0x10   : > { %p105_p11 = scmp.eq.s32.totalorder %s104_s29, 0  ;;  %p186_p12 = scmp.lt.s32.totalorder (!%p160_p10), %s505_s16, 1 }
  0x11   : > { %163 = sbr.rel (%p160_p10) target bundleno = 163 (0xa3), region = 32  ;;  %p188_p13 = scmp.lt.s32.totalorder (!%p160_p10), %s501_s15, 1 }
  0x12   : > { %s612_s30 = scalar_select %p105_p11, %s497_s14, %s107_s28  }
  0x13   : > { %s338_s28 = sshll.u32 (!%p160_p10), %s505_s16, 1  ;;  %s183_s29 = sand.u32 (!%p160_p10), 1, %s493_s13  }
  0x14   : > { %s244_s4 = sadd.s32 (!%p160_p10), %s501_s15, %s338_s28  ;;  %s334_s5 = sshll.u32 (!%p160_p10), %s183_s29, 3 }
  0x15   : > { %s339_s6 = sshll.u32 (!%p160_p10), %s244_s4, 3  ;;  %s443_s28 = scalar_lea.hbm (!%p160_p10), %s674_s3, 32 }
  0x16   : > { %v195_v0 = vld [vmem:[%s672_s1] sm:$0xff]  ;;  %v519_v1 = vmov 0   ;;  %v520_v2 = vmov 2   ;;  %v521_v4 = vmov 1   ;;  %v522_v5 = vmov 3   ;;  %s187_s8 = scalar_select %p186_p12, %s505_s16, 1 }
  0x17   : > { %417 = vset.pattern.permute.xlu0 %v519_v1  ;;  %419 = vset.pattern.permute.xlu1 %v520_v2  ;;  %v224_v3 = vld [vmem:[%s673_s2] sm:$0xff]  ;;  %s189_s9 = scalar_select %p188_p13, %s501_s15, 1 }
  0x18   : > { %198 = vperm.xlu0 %417, %v195_v0   ;;  %211 = vperm.xlu1 %419, %v195_v0   ;;  %s335_s10 = sshll.u32 %s187_s8, 1  ;;  %s246_s16 = scalar_lea.hbm %s674_s3, %s339_s6 }
  0x19   : > { %421 = vset.pattern.permute.xlu2 %v519_v1  ;;  %s191_s11 = sadd.s32 %s335_s10, %s189_s9  ;;  %s185_s9 = scalar_lea.vmem [#allocation2], %s334_s5 }
  0x1a   : > { %227 = vperm.xlu2 %421, %v224_v3   ;;  %s336_s20 = sshll.u32 %s191_s11, 2  ;;  %s248_s10 = sshll.u32 %s185_s9, 4  ;;  %s249_s10 = int_to_ptr.vmem [resolvable:$true] %s248_s10 }
  0x1b   : > { %s193_s27 = scalar_lea.vmem %s671_s0, %s336_s20  ;;  %s250_s15 = sshll.u32 %s246_s16, 4  ;;  %s251_s15 = int_to_ptr.hbm [resolvable:$true] %s250_s15 }
  0x1c   : > { %v194_v8 = vld [vmem:[%s193_s27] sm:$0xf]  ;;  %s234_s11 = scalar_lea.sflag [#allocation3], %s183_s29  ;;  %s437_s20 = sshra.s32 %s251_s15, 4  ;;  %s438_s20 = int_to_ptr.hbm [resolvable:$true] %s437_s20 }
  0x1d   : > { %v201_v9 = vperm.slane %v194_v8, 0  ;;  %v207_v10 = vperm.slane %v194_v8, 1  ;;  %v214_v11 = vperm.slane %v194_v8, 2  ;;  %v221_v12 = vperm.slane %v194_v8, 3  ;;  %s439_s21 = scalar_lea.hbm %s438_s20, 8  ;;  %p444_p4 = scmp.lt.s32.totalorder %s438_s20, %s674_s3 }
  0x1e   : > { %p440_p0 = scmp.ne.s32.totalorder %s438_s20, %s439_s21  ;;  %p445_p5 = scmp.lt.s32.totalorder %s443_s28, %s439_s21 }
  0x20   : > { %418 = vset.pattern.permute.xlu0 %v521_v4  ;;  %420 = vset.pattern.permute.xlu1 %v522_v5  ;;  %p441_p1 = pnand %p440_p0, %p594_p3  ;;  %p446_p6 = por %p445_p5, %p444_p4 }
  0x21   : > { %204 = vperm.xlu0 %418, %v195_v0   ;;  %218 = vperm.xlu1 %420, %v195_v0  }
  0x22   : > { %p442_p2 = pneg %p441_p1 }
  0x24   : > { %p447_p7 = pnand %p446_p6, %p442_p2 }
  0x29   : > { %422 = vset.pattern.permute.xlu0 %v519_v1 }
  0x74   : > { %v228_v21 = vpop.permute.xlu2 %227 }
  0x8a   : > { %v199_v6 = vpop.permute.xlu0 %198  ;;  %v212_v7 = vpop.permute.xlu1 %211 }
  0x8b   : > { %v202_v15 = vmul.f32 %v201_v9, %v199_v6  ;;  %v215_v17 = vmul.f32 %v214_v11, %v212_v7 }
  0x93   : > { %v205_v13 = vpop.permute.xlu0 %204  ;;  %v219_v14 = vpop.permute.xlu1 %218 }
  0x94   : > { %v208_v16 = vmul.f32 %v207_v10, %v205_v13  ;;  %v222_v19 = vmul.f32 %v221_v12, %v219_v14 }
  0x96   : > { %v209_v18 = vadd.f32 %v208_v16, %v202_v15 }
  0x98   : > { %v216_v20 = vadd.f32 %v215_v17, %v209_v18 }
  0x9a   : > { %v223_v22 = vadd.f32 %v222_v19, %v216_v20 }
  0x9c   : > { %v230_v23 = vadd.f32 %v228_v21, %v223_v22 }
  0x9e   : > { %v231_v24 = vmax.f32 %v230_v23, 0.0 }
  0xa0   : > { %232 = vst [vmem:[%s185_s9] sm:$0xff] %v231_v24 }
  0xa1   : > { %450 = shalt.err (!%p447_p7)
}
  0xa2   : > { %342 = dma.vmem_to_hbm [thread:$0]  (%p594_p3), %s249_s10, 128, %s251_s15, %s234_s11  }
  0xa3 PF: > { %p348_p9 = scmp.ge.s32.totalorder %s517_s19, 2  ;;  %s262_s29 = sand.u32 1, %s489_s12  }
  0xa4   : > { %s263_s6 = scalar_lea.sflag [#allocation3], %s262_s29 }
  0xa5   : > { %p345_p10 = pnand %p348_p9, %p603_p8 }
  0xa7   : > { %p346_p11 = pneg %p345_p10 }
  0xa9   : > { %484 = dma.done.wait (%p346_p11), %s263_s6, 128  }
  0xaa   : > { %486 = vsyncadd (%p346_p11), %s263_s6, 4294967168  ;;  %s16_s19 = sadd.s32 1, %s517_s19   ;;  %s677_s12 = smov %s493_s13 }
  0xab   : > { %p13_p12 = scmp.ge.s32.totalorder %s16_s19, 6   ;;  %s678_s13 = smov %s497_s14 }
  0xac   : > { %s679_s14 = smov %s612_s30  ;;  %s680_s15 = smov %s509_s17 }
  0xad   : > { %s681_s16 = smov %s513_s18  ;;  %s682_s17 = smov %s685_s22 }
  0xae   : > { %s683_s18 = smov %s689_s23  ;;  %15 = sbr.rel (!%p13_p12) target bundleno = 5 (0x5), region = 67 }
  0xb3   :  { %269 = vsyncpa [#allocation3], 1 }
  0xb4   :  { %271 = vsyncpa [#allocation3 + $0x1], 1 }

</bundles_post_ra>
